<compile_context>
chip_gen: v6e
topology: v6e:2x2x1
jax: 0.10.0
libtpu: 0.0.40
codegen_flags: <defaults>
</compile_context>

<pallas_src>
import functools

import jax
import jax.numpy as jnp
from jax.experimental import pallas as pl
from jax.experimental.pallas import tpu as pltpu


def _round_up(x, m):
    return ((x + m - 1) // m) * m


def _clamp_tile_m(tile_m, M):
    # Multiple of 128 (lane-friendly), never larger than the largest
    # 128-aligned block that fits inside the row count (when M >= 128).
    tile_m = max(128, (int(tile_m) // 128) * 128)
    return min(tile_m, max(128, (M // 128) * 128))


def _pick_tile_m(M, D, itemsize, target_block_bytes=4 << 20, max_tile=4096):
    """Row tile sized by a per-buffer VMEM byte budget (not a fixed row count)."""
    t = max(128, target_block_bytes // max(1, D * itemsize))
    return _clamp_tile_m(min(int(t), max_tile), M)


# ----------------------------- Pallas kernels ------------------------------ #

def _logits_kernel(emb_ref, w_ref, b_ref, out_ref):
    # Lane-dense GEMV on the MXU: (8, D) x (tile_m, D) -> (8, tile_m)
    # ('od,md->om' is the attention-score contraction).  Row 0 of w_ref holds
    # the real weight; rows 1..7 are zero padding.  f32 accumulation.
    z8 = jnp.einsum("od,md->om", w_ref[...], emb_ref[...],
                    preferred_element_type=jnp.float32)
    out_ref[...] = z8[0:1, :] + b_ref[0]          # (1, tile_m), lane-dense store


def _loss_partial_kernel(emb_ref, w_ref, b_ref, lab_ref, part_ref, *, n_valid):
    # n_valid is static (a recompile per distinct M; the grid shape forces one
    # anyway).  TODO(synk): pass it via scalar prefetch if M becomes dynamic.
    i = pl.program_id(0)
    tile_m = emb_ref.shape[0]

    z8 = jnp.einsum("od,md->om", w_ref[...], emb_ref[...],
                    preferred_element_type=jnp.float32)
    z = z8[0:1, :] + b_ref[0]                     # (1, tile_m) lane-dense logits
    y = lab_ref[...].astype(jnp.float32)          # (1, tile_m) lane-dense labels

    # numerically-stable binary_cross_entropy_with_logits (elementwise):
    #   max(z, 0) - z*y + log1p(exp(-|z|))
    per = jnp.maximum(z, 0.0) - z * y + jnp.log1p(jnp.exp(-jnp.abs(z)))

    base = i * tile_m
    is_full = base + tile_m <= n_valid            # only the ragged tail tile masks

    @pl.when(is_full)
    def _():
        part_ref[...] = jnp.broadcast_to(jnp.sum(per), part_ref.shape)

    @pl.when(jnp.logical_not(is_full))
    def _():
        col = jax.lax.broadcasted_iota(jnp.int32, (1, tile_m), 1)
        masked = jnp.where(base + col < n_valid, per, 0.0)
        part_ref[...] = jnp.broadcast_to(jnp.sum(masked), part_ref.shape)


# ------------------------------ host wrapper ------------------------------- #

def self_critic_head(embeds, weight, bias, labels=None, *, tile_m=None):
    """embeds: (B, S, D) float; weight: (D, 1) or (D,); bias: (1,);
    labels: optional (B, S)."""
    B, S, D = embeds.shape
    M = B * S
    dtype = embeds.dtype
    itemsize = jnp.dtype(dtype).itemsize

    if tile_m is None:
        tile_m = _pick_tile_m(M, D, itemsize)
    else:
        tile_m = _clamp_tile_m(tile_m, M)
    G = (M + tile_m - 1) // tile_m                # ragged final tile handled in-kernel

    emb2 = embeds.reshape(M, D)                   # free reshape; NO pad copy
    # Lane-dense weight block padded to 8 sublanes; cast to embeds dtype so the
    # matmul stays bf16 on the MXU (f32 accumulation).
    # TODO(synk): an f32 weight (exact PyTorch fidelity) would force an
    # in-kernel upcast of the big emb tile; bf16 weight is the perf choice.
    w8 = jnp.zeros((8, D), dtype).at[0].set(weight.reshape(-1).astype(dtype))
    b = bias.reshape((1,)).astype(jnp.float32)    # scalar -> SMEM

    emb_spec = pl.BlockSpec((tile_m, D), lambda i: (i, 0))
    w_spec = pl.BlockSpec((8, D), lambda i: (0, 0))              # resident
    b_spec = pl.BlockSpec(memory_space=pltpu.MemorySpace.SMEM)   # scalar in SMEM

    # Explicit VMEM budget (v5e scoped default is only 16 MiB; cap for v7x).
    vmem_need = (2 * tile_m * D * itemsize        # emb double-buffer
                 + 2 * tile_m * 4                 # label / logit lane rows
                 + 8 * D * itemsize               # resident weight block
                 + (1 << 20))                     # slack
    cparams = pltpu.CompilerParams(
        dimension_semantics=("parallel",),        # v7x megacore splits the M grid
        vmem_limit_bytes=int(min(64 << 20, max(2 * vmem_need, 16 << 20))))

    if labels is None:
        # Lane-dense (1, M) output slab, reshaped to (B, S, 1) on the host.
        logits_flat = pl.pallas_call(
            _logits_kernel,
            out_shape=jax.ShapeDtypeStruct((1, M), jnp.float32),
            grid_spec=pltpu.PrefetchScalarGridSpec(
                num_scalar_prefetch=0,
                grid=(G,),
                in_specs=[emb_spec, w_spec, b_spec],
                out_specs=pl.BlockSpec((1, tile_m), lambda i: (0, i)),
            ),
            compiler_params=cparams,
            cost_estimate=pl.CostEstimate(
                flops=2 * M * D, transcendentals=0,
                bytes_accessed=M * D * itemsize + M * 4 + 8 * D * itemsize),
        )(emb2, w8, b)
        return logits_flat.reshape(B, S, 1)

    lab2 = labels.reshape(1, M).astype(jnp.float32)       # lane-dense labels
    lab_spec = pl.BlockSpec((1, tile_m), lambda i: (0, i))
    part_spec = pl.BlockSpec((1, 1, 128), lambda i: (i, 0, 0))

    kern = functools.partial(_loss_partial_kernel, n_valid=M)
    partials = pl.pallas_call(
        kern,
        out_shape=jax.ShapeDtypeStruct((G, 1, 128), jnp.float32),
        grid_spec=pltpu.PrefetchScalarGridSpec(
            num_scalar_prefetch=0,
            grid=(G,),
            in_specs=[emb_spec, w_spec, b_spec, lab_spec],
            out_specs=part_spec,
        ),
        compiler_params=cparams,
        cost_estimate=pl.CostEstimate(
            flops=2 * M * D, transcendentals=2 * M,
            bytes_accessed=M * D * itemsize + M * 4 + 8 * D * itemsize + G * 512),
    )(emb2, w8, b, lab2)

    # All 128 lanes of each partial block hold the same per-tile sum.
    return jnp.sum(partials[:, 0, 0]) / M


class SelfCritic:
    """JAX/Pallas port of muse_maskgit_pytorch.SelfCritic (forward only)."""

    def __init__(self, dim, num_tokens=64, key=None):
        if key is None:
            key = jax.random.PRNGKey(0)
        k_emb, k_w, k_b = jax.random.split(key, 3)
        self.dim = dim
        # TODO(synk): the full MaskGit transformer `net` is not replicated;
        # stand it in with a deterministic bf16 embedding-table lookup.
        self.embed_table = (jax.random.normal(
            k_emb, (num_tokens, dim), jnp.float32) * 0.02).astype(jnp.bfloat16)
        # nn.Linear(dim, 1) default init: U(-1/sqrt(dim), 1/sqrt(dim))
        bound = 1.0 / (dim ** 0.5)
        self.to_pred_w = jax.random.uniform(k_w, (dim, 1), jnp.float32,
                                            -bound, bound)
        self.to_pred_b = jax.random.uniform(k_b, (1,), jnp.float32,
                                            -bound, bound)

    def _net(self, x):
        # (B, S) int token ids -> (B, S, D) bf16 embeds; plain-JAX glue.
        embeds = jnp.take(self.embed_table, x, axis=0)
        return None, embeds

    def __call__(self, x, labels=None, *, tile_m=None):
        _, embeds = self._net(x)
        return self_critic_head(embeds, self.to_pred_w, self.to_pred_b, labels,
                                tile_m=tile_m)


# ----------------------------------- main ----------------------------------- #

if __name__ == "__main__":
    B, S, DIM, NUM_TOKENS = 2, 100, 128, 64   # M = 200 rows
    # Auto tile picker -> tile_m = 128 -> grid of 2 steps, ragged final tile
    # (72 valid rows), exercising the in-kernel mask and masked output stores.

    key = jax.random.PRNGKey(0)
    k_model, k_x, k_lab = jax.random.split(key, 3)

    model = SelfCritic(DIM, num_tokens=NUM_TOKENS, key=k_model)

    x = jax.random.randint(k_x, (B, S), 0, NUM_TOKENS, dtype=jnp.int32)
    labels = jax.random.bernoulli(k_lab, 0.5, (B, S)).astype(jnp.float32)

    # Path 1: no labels -> logits of shape (B, S, 1)
    logits = jax.block_until_ready(model(x))

    # Path 2: labels -> scalar BCE-with-logits loss
    loss = jax.block_until_ready(model(x, labels=labels))

    # Pure-JAX reference (same bf16 inputs, f32 accumulation)
    embeds_ref = jnp.take(model.embed_table, x, axis=0)          # bf16 (B,S,D)
    w_bf = model.to_pred_w.astype(jnp.bfloat16)
    logits_ref = (embeds_ref.astype(jnp.float32)
                  @ w_bf.astype(jnp.float32)) + model.to_pred_b  # (B,S,1) f32
    z = logits_ref[..., 0]
    loss_ref = jnp.mean(jnp.maximum(z, 0.0) - z * labels
                        + jnp.log1p(jnp.exp(-jnp.abs(z))))

    assert logits.shape == (B, S, 1)
    assert jnp.allclose(logits, logits_ref, atol=1e-5, rtol=1e-4)
    assert jnp.allclose(loss, loss_ref, atol=1e-5, rtol=1e-4)

    print("KERNEL_OK")
</pallas_src>

<mosaic_0001>
module attributes {stable_mosaic.version = 11 : i64} {
  func.func @_logits_kernel(%arg0: i32, %arg1: memref<128x128xbf16, #tpu.memory_space<vmem>>, %arg2: memref<8x128xbf16, #tpu.memory_space<vmem>>, %arg3: memref<1xf32, #tpu.memory_space<smem>>, %arg4: memref<1x128xf32, #tpu.memory_space<vmem>>) attributes {dimension_semantics = [#tpu.dimension_semantics<parallel>], iteration_bounds = array<i64: 2>, scalar_prefetch = 0 : i64, scratch_operands = 0 : i64, tpu.core_type = #tpu.core_type<tc>, window_params = [{transform_indices = @transform_0, window_bounds = array<i64: 128, 128>}, {pipeline_mode = #tpu.pipeline_mode<synchronous>, transform_indices = @transform_1, window_bounds = array<i64: 8, 128>}, {transform_indices = @transform_2, window_bounds = array<i64: 1>}, {transform_indices = @transform_3, window_bounds = array<i64: 1, 128>}]} {
    %c0 = arith.constant 0 : index
    %c0_0 = arith.constant 0 : index
    %0 = vector.load %arg2[%c0, %c0_0] : memref<8x128xbf16, #tpu.memory_space<vmem>>, vector<8x128xbf16>
    %c0_1 = arith.constant 0 : index
    %c0_2 = arith.constant 0 : index
    %1 = vector.load %arg1[%c0_1, %c0_2] : memref<128x128xbf16, #tpu.memory_space<vmem>>, vector<128x128xbf16>
    "tpu.trace_start"() <{level = 10 : i32, message = "od,md->om"}> : () -> ()
    %cst = arith.constant dense<0.000000e+00> : vector<8x128xf32>
    %2 = tpu.matmul %0, %1, %cst {dimension_numbers = #tpu.dot_dimension_numbers<[1], [1], [0], [0], [0, 0, 1, 0], [], []>} : vector<8x128xbf16>, vector<128x128xbf16>, vector<8x128xf32> -> vector<8x128xf32>
    "tpu.trace_stop"() : () -> ()
    %3 = vector.extract_strided_slice %2 {offsets = [0, 0], sizes = [1, 128], strides = [1, 1]} : vector<8x128xf32> to vector<1x128xf32>
    %c0_3 = arith.constant 0 : index
    %4 = memref.load %arg3[%c0_3] : memref<1xf32, #tpu.memory_space<smem>>
    %5 = vector.broadcast %4 : f32 to vector<1x128xf32>
    %6 = arith.addf %3, %5 : vector<1x128xf32>
    %c0_4 = arith.constant 0 : index
    %c0_5 = arith.constant 0 : index
    %7 = vector.load %arg4[%c0_4, %c0_5] : memref<1x128xf32, #tpu.memory_space<vmem>>, vector<1x128xf32>
    tpu.vector_store %arg4[%c0_4, %c0_5], %6 {strides = array<i32>} : memref<1x128xf32, #tpu.memory_space<vmem>>, vector<1x128xf32>,
    return
  }
  func.func @transform_0(%arg0: i32) -> (i32, i32) {
    %c0_i32 = arith.constant 0 : i32
    %c0_i32_0 = arith.constant 0 : i32
    return %arg0, %c0_i32 : i32, i32
  }
  func.func @transform_1(%arg0: i32) -> (i32, i32) {
    %c0_i32 = arith.constant 0 : i32
    %c0_i32_0 = arith.constant 0 : i32
    %c0_i32_1 = arith.constant 0 : i32
    return %c0_i32, %c0_i32_0 : i32, i32
  }
  func.func @transform_2(%arg0: i32) -> i32 {
    %c0_i32 = arith.constant 0 : i32
    %c0_i32_0 = arith.constant 0 : i32
    return %c0_i32 : i32
  }
  func.func @transform_3(%arg0: i32) -> (i32, i32) {
    %c0_i32 = arith.constant 0 : i32
    %c0_i32_0 = arith.constant 0 : i32
    return %c0_i32, %arg0 : i32, i32
  }
}

</mosaic_0001>

<bundles_post_ra>
// kernel: tpu_custom_call.1
= control target key start
LH: loop header
LB: loop body
LE: loop exit
PB: predicated region body
PF: predicated region fallthrough
CT: control target
= control target key end

     0   :  { %s862_s0 = inlined_call_operand.hbm [shape: bf16[200,128], index: 0, kind: input, shape index: {}]   ;;  %s863_s1 = inlined_call_operand.hbm [shape: bf16[8,128], index: 1, kind: input, shape index: {}]   ;;  %s864_s2 = inlined_call_operand.<no memory space> [shape: f32[1], index: 2, kind: input, shape index: {}]   ;;  %s865_s3 = inlined_call_operand.hbm [shape: f32[1,200], index: 3, kind: output, shape index: {}]  }
   0x1   :  { %8 = sst [smem:[#allocation2]] %s864_s2 }
   0x2   :  { %9 = vsyncpa [#allocation4], 0 }
   0x3   :  { %11 = vsyncpa [#allocation4 + $0x1], 0 }
   0x4   :  { %12 = vsyncpa [#allocation7], 0 }
   0x5   :  { %13 = vsyncpa [#allocation5], 0 }
   0x6   :  { %15 = vsyncpa [#allocation5 + $0x1], 0  ;;  %s682_s14 = smov 0   ;;  %s684_s15 = smov 0  }
   0x7   :  { %s686_s16 = smov 0   ;;  %s688_s17 = smov 0  }
   0x8 LB: > { %s703_s2 = sadd.s32 4294967295, %s650_s17   ;;  %s412_s18 = sadd.s32 4294967294, %s650_s17   ;;  %s650_s17 = sphi %s688_s17, %s881_s17   ;;  %s646_s16 = sphi %s686_s16, %s880_s16   ;;  %s642_s15 = sphi %s684_s15, %s879_s15   ;;  %s638_s14 = sphi %s682_s14, %s878_s14  }
   0x9   : > { %s707_s19 = sadd.s32 1, %s650_s17   ;;  %s28_s20 = sadd.s32 1, %s646_s16 }
   0xa   : > { %s25_s21 = ssub.s32 %s650_s17, %s707_s19  ;;  %p35_p0 = scmp.ne.s32.totalorder %s646_s16, %s642_s15 }
   0xb   : > { %p26_p1 = scmp.eq.s32.totalorder %s25_s21, 0  ;;  %p36_p2 = scmp.eq.s32.totalorder %s650_s17, 0 }
   0xc   : > { %p41_p3 = scmp.ne.s32.totalorder %s642_s15, %s638_s14  ;;  %p42_p4 = scmp.eq.s32.totalorder %s703_s2, 0 }
   0xd   : > { %s719_s22 = scalar_select %p26_p1, %s646_s16, %s28_s20  }
   0xe   : > { %p721_p5 = por %p36_p2, %p35_p0  ;;  %p727_p6 = por %p42_p4, %p41_p3 }
   0xf   : > { %p107_p7 = scmp.eq.s32.totalorder %s703_s2, 1  ;;  %p113_p8 = scmp.eq.s32.totalorder %s412_s18, 1 }
  0x10   : > { %s870_s24 = scalar_select %p727_p6, 1, 0 }
  0x11   : > { %p413_p9 = scmp.ge.s32.totalorder %s650_s17, 1  ;;  %p120_p10 = scmp.lt.s32.totalorder %s650_s17, 3 }
  0x12   : > { %p734_p11 = por %p107_p7, %p35_p0  ;;  %p738_p12 = por %p113_p8, %p41_p3 }
  0x13   : > { %p742_p13 = pnand %p413_p9, %p120_p10  ;;  %s652_s28 = smov [#allocation6]  }
  0x14   : > { %s871_s25 = scalar_select %p734_p11, 1, 0 }
  0x15   : > { %s872_s26 = scalar_select %p738_p12, 1, 0 }
  0x16   : > { %p474_p1 = pneg %p742_p13  ;;  %s133_s29 = sshll.u32 %s652_s28, 4  ;;  %s134_s29 = int_to_ptr.vmem [resolvable:$true] %s133_s29 }
  0x17   : > { %s541_s30 = scalar_lea.vmem %s134_s29, 64  ;;  %p549_p8 = scmp.lt.s32.totalorder %s134_s29, %s134_s29 }
  0x18   : > { %p475_p2 = pnand %p474_p1, %p42_p4  ;;  %p542_p7 = scmp.ne.s32.totalorder %s134_s29, %s541_s30 }
  0x19   : > { %p550_p6 = scmp.lt.s32.totalorder %s541_s30, %s541_s30 }
  0x1a   : > { %p532_p0 = pneg %p475_p2 }
  0x1b   : > { %p551_p12 = por %p550_p6, %p549_p8 }
  0x1c   : > { %p544_p11 = pnand %p542_p7, %p532_p0 }
  0x1e   : > { %p545_p3 = pneg %p544_p11 }
  0x20   : > { %p552_p9 = pnand %p551_p12, %p545_p3 }
  0x22   : > { %555 = shalt.err (!%p552_p9)
}
  0x23   : > { %477 = dma.hbm_to_vmem [thread:$0]  (!%p475_p2), %s863_s1, 64, %s134_s29, [#allocation7]  }
  0x24   : > { %p868_p10 = scmp.ge.s32.totalorder %s650_s17, 2 }
  0x26   : > { %143 = sbr.rel (%p868_p10) target bundleno = 75 (0x4b), region = 24 }
  0x2b   : > { %146 = sbr.rel (!%p721_p5) target bundleno = 75 (0x4b), region = 28  ;;  %s147_s6 = sand.u32 (%p721_p5), 1, %s646_s16  }
  0x2c   : > { %s417_s7 = sshll.u32 (%p721_p5), %s650_s17, 4  ;;  %s416_s8 = sshll.u32 (%p721_p5), %s147_s6, 6 }
  0x2d   : > { %s153_s9 = ssub.s32 (%p721_p5), 25, %s417_s7  ;;  %s763_s12 = scalar_lea.sflag (%p721_p5), [#allocation4], %s147_s6 }
  0x2e   : > { %p154_p6 = scmp.lt.s32.totalorder (%p721_p5), %s153_s9, 16  ;;  %s151_s13 = scalar_lea.vmem (%p721_p5), [#allocation3], %s416_s8 }
  0x30   : > { %s883_s9 = smov (!%p154_p6, %s153_s9), 16 }
  0x31   : > { %s760_s10 = sshll.u32 %s883_s9, 6 }
  0x32   : > { %s158_s11 = ssub.s32 1024, %s760_s10 }
  0x33   : > { %159 = vsyncadd %s763_s12, %s158_s11  ;;  %p419_p5 = scmp.ne.s32.totalorder %s760_s10, 0  ;;  %s437_s18 = sshll.u32 %s650_s17, 10 }
  0x34   : > { %s771_s23 = scalar_lea.hbm %s862_s0, %s437_s18  ;;  %s164_s28 = sshll.u32 %s151_s13, 4  ;;  %s773_s28 = int_to_ptr.vmem [resolvable:$true] %s164_s28 }
  0x35   : > { %s556_s29 = scalar_lea.hbm %s771_s23, %s760_s10  ;;  %s560_s5 = scalar_lea.hbm %s862_s0, 1600 }
  0x36   : > { %p557_p11 = scmp.ne.s32.totalorder %s771_s23, %s556_s29  ;;  %p561_p2 = scmp.lt.s32.totalorder %s771_s23, %s862_s0 }
  0x37   : > { %p562_p0 = scmp.lt.s32.totalorder %s560_s5, %s556_s29 }
  0x38   : > { %p558_p12 = pnand %p557_p11, %p419_p5 }
  0x39   : > { %p563_p7 = por %p562_p0, %p561_p2 }
  0x3a   : > { %p559_p1 = pneg %p558_p12 }
  0x3c   : > { %p564_p3 = pnand %p563_p7, %p559_p1 }
  0x3e   : > { %567 = shalt.err (!%p564_p3)
}
  0x3f   : > { %s568_s8 = scalar_lea.vmem %s773_s28, %s760_s10  ;;  %s653_s9 = smov [#allocation3]  }
  0x40   : > { %p569_p8 = scmp.ne.s32.totalorder %s773_s28, %s568_s8  ;;  %s572_s11 = sshll.u32 %s653_s9, 4  ;;  %s573_s11 = int_to_ptr.vmem [resolvable:$false] %s572_s11 }
  0x41   : > { %s574_s13 = scalar_lea.vmem %s573_s11, 2048  ;;  %p575_p11 = scmp.lt.s32.totalorder %s773_s28, %s573_s11 }
  0x42   : > { %p570_p9 = pnand %p569_p8, %p419_p5  ;;  %p576_p12 = scmp.lt.s32.totalorder %s574_s13, %s568_s8 }
  0x44   : > { %p571_p6 = pneg %p570_p9  ;;  %p577_p10 = por %p576_p12, %p575_p11 }
  0x46   : > { %p578_p2 = pnand %p577_p10, %p571_p6 }
  0x48   : > { %581 = shalt.err (!%p578_p2)
}
  0x49   : > { %s654_s18 = smov 64   ;;  %s655_s20 = smov 4  }
  0x4a   : > { %170 = dma.hbm_to_vmem [thread:$0]  (%p419_p5), %s771_s23, %s760_s10, %s773_s28, %s763_s12, %s654_s18, %s654_s18, %s655_s20  }
  0x4b PF: > { %176 = sbr.rel (%p742_p13) target bundleno = 357 (0x165), region = 32  ;;  %s802_s21 = sand.u32 (!%p742_p13), 1, %s642_s15  }
  0x4c   : > { %s424_s29 = sshll.u32 (!%p742_p13), %s802_s21, 6  ;;  %s179_s30 = scalar_lea.sflag (!%p742_p13), [#allocation4], %s802_s21 }
  0x4d   : > { %s182_s4 = scalar_lea.vmem (!%p742_p13), [#allocation3], %s424_s29  ;;  %p874_p10 = scmp.ne.s32.totalorder (!%p742_p13), %s870_s24, 0 }
  0x50   : > { %625 = dma.done.wait (%p874_p10), %s179_s30, 1024  }
  0x51   : > { %627 = vsyncadd (%p874_p10), %s179_s30, 4294966272 }
  0x52   : > { %629 = dma.done.wait (%p42_p4), [#allocation7], 64  }
  0x53   : > { %631 = vsyncadd (%p42_p4), [#allocation7], 4294967232  ;;  %v656_v0 = vmov 0.0   ;;  %vm657_vm0 = vmmov 0   ;;  %v522_v1 = vld [vmem:[%s182_s4 + $0x38] sm:$0xff]   ;;  %v523_v2 = vld [vmem:[%s182_s4 + $0x30] sm:$0xff]  }
  0x54   : > { %447 = vmatprep.subr.bf16.mxu0 %v656_v0  ;;  %463 = vmatprep.mubr.msk.bf16.mxu0 %vm657_vm0, %v656_v0  ;;  %v524_v3 = vld [vmem:[%s182_s4 + $0x28] sm:$0xff]   ;;  %v525_v4 = vld [vmem:[%s182_s4 + $0x20] sm:$0xff]   ;;  %v526_v5 = vld [vmem:[%s182_s4 + $0x18] sm:$0xff]   ;;  %s319_s24 = sld [smem:[#allocation2]]  ;;  %s434_s27 = sshll.u32 %s703_s2, 4 }
  0x55   : > { %448 = vmatpush3.bf16.xpose.msra.mxu0 %v522_v1  ;;  %v527_v6 = vld [vmem:[%s182_s4 + $0x10] sm:$0xff]   ;;  %v528_v7 = vld [vmem:[%s182_s4 + $0x8] sm:$0xff]   ;;  %v529_v8 = vld [vmem:[%s182_s4] sm:$0xff]   ;;  %s207_s10 = scalar_lea.vmem [#allocation8], %s802_s21  ;;  %s819_s5 = scalar_lea.hbm %s865_s3, %s434_s27 }
  0x56   : > { %449 = vmatprep.subr.bf16.mxu0 %v656_v0  ;;  %v214_v9 = vld [vmem:[#allocation6] sm:$0xf]  ;;  %s336_s12 = sshll.u32 %s207_s10, 4  ;;  %s324_s6 = scalar_lea.sflag [#allocation5], %s802_s21  ;;  %s821_s12 = int_to_ptr.vmem [resolvable:$true] %s336_s12 }
  0x57   : > { %s582_s7 = scalar_lea.vmem %s821_s12, 16  ;;  %p875_p13 = scmp.ne.s32.totalorder %s871_s25, 0 }
  0x58   : > { %p583_p4 = scmp.ne.s32.totalorder %s821_s12, %s582_s7  ;;  %s658_s2 = smov [#allocation8]  }
  0x59   : > { %s586_s8 = sshll.u32 %s658_s2, 4  ;;  %s587_s8 = int_to_ptr.vmem [resolvable:$false] %s586_s8 }
  0x5a   : > { %v320_v10 = vstv %s319_s24  ;;  %p584_p5 = pnand %p583_p4, %p875_p13  ;;  %s588_s9 = scalar_lea.vmem %s587_s8, 32 }
  0x5b   : > { %p589_p0 = scmp.lt.s32.totalorder %s821_s12, %s587_s8  ;;  %p590_p7 = scmp.lt.s32.totalorder %s588_s9, %s582_s7 }
  0x5c   : > { %p585_p1 = pneg %p584_p5 }
  0x5d   : > { %450 = vmatpush3.bf16.xpose.msra.mxu0 %v523_v2  ;;  %p591_p3 = por %p590_p7, %p589_p0 }
  0x5e   : > { %451 = vmatprep.subr.bf16.mxu0 %v656_v0 }
  0x5f   : > { %p592_p8 = pnand %p591_p3, %p585_p1 }
  0x65   : > { %452 = vmatpush3.bf16.xpose.msra.mxu0 %v524_v3 }
  0x66   : > { %453 = vmatprep.subr.bf16.mxu0 %v656_v0 }
  0x6d   : > { %454 = vmatpush3.bf16.xpose.msra.mxu0 %v525_v4 }
  0x6e   : > { %455 = vmatprep.subr.bf16.mxu0 %v656_v0 }
  0x75   : > { %456 = vmatpush3.bf16.xpose.msra.mxu0 %v526_v5 }
  0x76   : > { %457 = vmatprep.subr.bf16.mxu0 %v656_v0 }
  0x7d   : > { %458 = vmatpush3.bf16.xpose.msra.mxu0 %v527_v6 }
  0x7e   : > { %459 = vmatprep.subr.bf16.mxu0 %v656_v0 }
  0x85   : > { %460 = vmatpush3.bf16.xpose.msra.mxu0 %v528_v7 }
  0x86   : > { %461 = vmatprep.subr.bf16.mxu0 %v656_v0 }
  0x8d   : > { %462 = vmatpush3.bf16.xpose.msra.mxu0 %v529_v8 }
  0x94   : > { %464 = vmatmul.mubr.bf16.vlgmr.msra.gmra.mxu0 %v214_v9 }
 0x154   : > { %v313_v11 = vpop.f32.mrf.mxu0 }
 0x155   : > { %v321_v12 = vadd.f32 %v320_v10, %v313_v11 }
 0x156   : > { %v465_v13 = vpop.f32.mrf.mxu0 }
 0x157   : > { %322 = vst [vmem:[%s207_s10] sm:$0x1] %v321_v12 }
 0x158   : > { %v316_v14 = vpop.f32.mrf.mxu0 }
 0x159   : > { %595 = shalt.err (!%p592_p8)
}
 0x15a   : > { %s596_s11 = scalar_lea.hbm %s819_s5, 16  ;;  %s600_s20 = scalar_lea.hbm %s865_s3, 32 }
 0x15b   : > { %p597_p9 = scmp.ne.s32.totalorder %s819_s5, %s596_s11  ;;  %p601_p12 = scmp.lt.s32.totalorder %s819_s5, %s865_s3 }
 0x15c   : > { %p602_p2 = scmp.lt.s32.totalorder %s600_s20, %s596_s11 }
 0x15d   : > { %p598_p6 = pnand %p597_p9, %p875_p13 }
 0x15e   : > { %p603_p10 = por %p602_p2, %p601_p12 }
 0x15f   : > { %p599_p11 = pneg %p598_p6 }
 0x161   : > { %p604_p4 = pnand %p603_p10, %p599_p11 }
 0x163   : > { %607 = shalt.err (!%p604_p4)
}
 0x164   : > { %472 = dma.vmem_to_hbm [thread:$0]  (%p875_p13), %s821_s12, 16, %s819_s5, %s324_s6   ;;  %v466_v15 = vpop.f32.mrf.mxu0 }
 0x165 PF: > { %s348_s30 = sand.u32 1, %s638_s14   ;;  %p876_p5 = scmp.ne.s32.totalorder %s872_s26, 0 }
 0x166   : > { %p877_p1 = scmp.ge.s32.totalorder %s650_s17, 2  ;;  %s349_s4 = scalar_lea.sflag [#allocation5], %s348_s30 }
 0x168   : > { %p479_p0 = pnand %p877_p1, %p876_p5 }
 0x16a   : > { %p480_p7 = pneg %p479_p0 }
 0x16c   : > { %633 = dma.done.wait (%p480_p7), %s349_s4, 16  }
 0x16d   : > { %635 = vsyncadd (%p480_p7), %s349_s4, 4294967280  ;;  %p18_p3 = scmp.ge.s32.totalorder %s707_s19, 4   ;;  %s878_s14 = smov %s642_s15 }
 0x16e   : > { %s879_s15 = smov %s646_s16  ;;  %s880_s16 = smov %s719_s22 }
 0x16f   : > { %s881_s17 = smov %s707_s19  ;;  %20 = sbr.rel (!%p18_p3) target bundleno = 8 (0x8), region = 81 }
 0x174   :  { %353 = vsyncpa [#allocation4], 1 }
 0x175   :  { %355 = vsyncpa [#allocation4 + $0x1], 1 }
 0x176   :  { %356 = vsyncpa [#allocation7], 1 }
 0x177   :  { %357 = vsyncpa [#allocation5], 1 }
 0x178   :  { %359 = vsyncpa [#allocation5 + $0x1], 1 }

</bundles_post_ra>
